<compile_context>
chip_gen: v6e
topology: v6e:2x2x1
jax: 0.10.0
libtpu: 0.0.40
codegen_flags: <defaults>
</compile_context>

<pallas_src>
from functools import partial

import jax
import jax.numpy as jnp
import numpy as np
from jax.experimental import pallas as pl
from jax.experimental.pallas import tpu as pltpu


def _round_up(x: int, m: int) -> int:
    return ((x + m - 1) // m) * m


def _rfft_kernel(w_ref, x_ref, o_ref):
    """One (tile_f, tile_n) output tile of W @ X; grid axis 2 is the T reduction.

    The output BlockSpec ignores the T axis, so o_ref is resident across the
    reduction: write on the first step, accumulate afterwards (no scratch).
    """
    t = pl.program_id(2)
    prod = jnp.dot(w_ref[...], x_ref[...], preferred_element_type=jnp.float32)

    @pl.when(t == 0)
    def _first():
        o_ref[...] = prod

    @pl.when(t > 0)
    def _rest():
        o_ref[...] += prod


def build_rfft_matrix(n: int, rows: int, t_pad: int, norm, dtype):
    """Stacked [cos; sin] RFFT basis, zero-padded once to shape (rows, t_pad).

    Row layout: rows [0, n_freq) = cos (real part), rows [n_freq, 2*n_freq) = sin
    (imag part), remaining rows are zero padding.
    """
    n_freq = n // 2 + 1
    k = np.arange(n_freq, dtype=np.float64)[:, None]
    t = np.arange(n, dtype=np.float64)[None, :]
    ang = -2.0 * np.pi * k * t / n                      # exp(-2*pi*i*k*t/n)
    if norm in (None, "backward"):
        scale = 1.0
    elif norm == "forward":
        scale = 1.0 / n
    elif norm == "ortho":
        scale = 1.0 / np.sqrt(n)
    else:
        raise ValueError(f"unsupported norm: {norm!r}")
    w = np.zeros((rows, t_pad), dtype=np.float64)
    w[:n_freq, :n] = np.cos(ang) * scale
    w[n_freq: 2 * n_freq, :n] = np.sin(ang) * scale
    return jnp.asarray(w, dtype=dtype)


@partial(jax.jit, static_argnames=("n_time_steps", "norm", "compute_dtype"))
def rfft_module_forward(
    x: jax.Array,
    n_time_steps: int | None = None,
    norm: str | None = None,
    compute_dtype=jnp.float32,
) -> jax.Array:
    """Pallas equivalent of RFFTModule.forward (implementation='rfft', dtype=cfloat)."""
    # TODO(synk): implementation='matmul' (full T x T complex DFT buffer built with
    # torch.fft.fft2) is not ported; only the module's default 'rfft' path is here.
    B, T, D = x.shape
    n = T if n_time_steps is None else int(n_time_steps)
    if n < T:                                   # torch.fft.rfft(n=...) truncates
        x = x[:, :n, :]
    n_freq = n // 2 + 1
    bd = B * D
    itemsize = jnp.dtype(compute_dtype).itemsize

    # ---- lane axis (B*D, output/X minor dim): lane-dense, multiple of 128 ------
    bd_pad = _round_up(bd, 128)
    tile_n = next(tn for tn in (512, 256, 128) if bd_pad % tn == 0)
    n_c = bd_pad // tile_n

    # ---- frequency axis (stacked cos|sin rows), padded ONCE -------------------
    rows_raw = 2 * n_freq
    rows8 = _round_up(rows_raw, 8)
    if rows8 <= 256:
        tile_f, rows = rows8, rows8             # single F tile, minimal padding
    else:
        rows = _round_up(rows_raw, 128)
        tile_f = 256 if rows % 256 == 0 else 128
        # v7x megacore balance: prefer >= 2 parallel output tiles.
        if tile_f == 256 and (rows // 256) * n_c < 2:
            tile_f = 128
    n_f = rows // tile_f

    # ---- contraction axis (time): full-dim block when it fits so the W block is
    # invariant as the lane axis sweeps (no W re-streaming from HBM) -------------
    if n <= 2048:
        t_pad = _round_up(n, 8) if n < 128 else _round_up(n, 128)
        tile_t = t_pad
    else:
        tile_t = 1024
        t_pad = _round_up(n, tile_t)
    n_t = t_pad // tile_t

    w = build_rfft_matrix(n, rows, t_pad, norm, compute_dtype)

    # lane-dense operand: (T, B*D), zero-padded; the zero pad also realizes rfft's
    # n > T zero-padding semantics. Fused with the pallas_call under this jit.
    x2 = jnp.transpose(x, (1, 0, 2)).reshape(x.shape[1], bd).astype(compute_dtype)
    pad_t, pad_n = t_pad - x2.shape[0], bd_pad - bd
    if pad_t or pad_n:
        x2 = jnp.pad(x2, ((0, pad_t), (0, pad_n)))

    # HBM traffic including panel re-reads under this tiling:
    #   W is re-read per lane tile only when the reduction is split (n_t > 1);
    #   X is re-read once per frequency tile; output written once.
    w_bytes = rows * t_pad * itemsize * (1 if n_t == 1 else n_c)
    x_bytes = t_pad * bd_pad * itemsize * n_f
    o_bytes = rows * bd_pad * 4
    cost = pl.CostEstimate(
        flops=2 * rows * t_pad * bd_pad,
        transcendentals=0,
        bytes_accessed=int(w_bytes + x_bytes + o_bytes),
    )

    # double-buffered working-set estimate; raise scoped VMEM (v5e default 16 MiB)
    # instead of shrinking tiles when blocks get big.
    blk_bytes = 2 * (tile_f * tile_t + tile_t * tile_n) * itemsize + 2 * tile_f * tile_n * 4
    vmem_limit = 32 * 1024 * 1024 if blk_bytes > 12 * 1024 * 1024 else None

    out_slab = pl.pallas_call(
        _rfft_kernel,
        out_shape=jax.ShapeDtypeStruct((rows, bd_pad), jnp.float32),
        grid_spec=pltpu.PrefetchScalarGridSpec(
            num_scalar_prefetch=0,
            grid=(n_f, n_c, n_t),
            in_specs=[
                pl.BlockSpec((tile_f, tile_t), lambda f, c, t: (f, t)),  # W tile
                # If profiling shows exposed DMA on the X stream, add
                # pipeline_mode=pl.Buffered(3) here.
                pl.BlockSpec((tile_t, tile_n), lambda f, c, t: (t, c)),  # X tile
            ],
            out_specs=pl.BlockSpec((tile_f, tile_n), lambda f, c, t: (f, c)),
        ),
        compiler_params=pltpu.CompilerParams(
            dimension_semantics=("parallel", "parallel", "arbitrary"),
            vmem_limit_bytes=vmem_limit,
        ),
        cost_estimate=cost,
    )(w, x2)

    # Split stacked slab into real/imag, drop padding, restore (B, F, D). The
    # complex64 assembly stays outside the kernel (Pallas TPU has no complex
    # vregs) but fuses with the surrounding slices under this jit.
    real = out_slab[:n_freq, :bd].reshape(n_freq, B, D).transpose(1, 0, 2)
    imag = out_slab[n_freq: 2 * n_freq, :bd].reshape(n_freq, B, D).transpose(1, 0, 2)
    return jax.lax.complex(real, imag).astype(jnp.complex64)


if __name__ == "__main__":
    B, T, D = 2, 8, 32  # (BATCH, TIME_STEPS, SYSTEM_DIMENSIONS)
    key = jax.random.PRNGKey(0)
    x = jax.random.normal(key, (B, T, D), dtype=jnp.float32)

    # default path: f32 weights, norm=None (matches torch.fft.rfft defaults)
    out = jax.block_until_ready(rfft_module_forward(x, n_time_steps=T))
    ref = jnp.fft.rfft(x, n=T, axis=1).astype(jnp.complex64)
    assert out.shape == (B, T // 2 + 1, D)
    assert out.dtype == jnp.complex64
    np.testing.assert_allclose(np.asarray(out), np.asarray(ref), rtol=1e-4, atol=1e-4)

    # n_time_steps > T zero-padding semantics of torch.fft.rfft(n=...)
    n_pad = 16
    out_pad = jax.block_until_ready(rfft_module_forward(x, n_time_steps=n_pad))
    ref_pad = jnp.fft.rfft(x, n=n_pad, axis=1).astype(jnp.complex64)
    assert out_pad.shape == (B, n_pad // 2 + 1, D)
    np.testing.assert_allclose(np.asarray(out_pad), np.asarray(ref_pad), rtol=1e-4, atol=1e-4)

    # 'ortho' norm path
    out_ortho = jax.block_until_ready(rfft_module_forward(x, n_time_steps=T, norm="ortho"))
    ref_ortho = (jnp.fft.rfft(x, n=T, axis=1) / jnp.sqrt(T)).astype(jnp.complex64)
    np.testing.assert_allclose(np.asarray(out_ortho), np.asarray(ref_ortho), rtol=1e-4, atol=1e-4)

    # bf16 compute path (MXU-native rate, half VMEM/HBM traffic); twiddle factors
    # are quantized to ~8 mantissa bits so tolerance is loose by construction.
    out_bf16 = jax.block_until_ready(
        rfft_module_forward(x, n_time_steps=T, compute_dtype=jnp.bfloat16)
    )
    np.testing.assert_allclose(np.asarray(out_bf16), np.asarray(ref), rtol=5e-2, atol=2e-1)

    print("KERNEL_OK")
</pallas_src>

<mosaic_0001>
module attributes {stable_mosaic.version = 11 : i64} {
  func.func @_rfft_kernel(%arg0: i32, %arg1: i32, %arg2: i32, %arg3: memref<16x8xf32, #tpu.memory_space<vmem>>, %arg4: memref<8x128xf32, #tpu.memory_space<vmem>>, %arg5: memref<16x128xf32, #tpu.memory_space<vmem>>) attributes {dimension_semantics = [#tpu.dimension_semantics<parallel>, #tpu.dimension_semantics<parallel>, #tpu.dimension_semantics<arbitrary>], iteration_bounds = array<i64: 1, 1, 1>, scalar_prefetch = 0 : i64, scratch_operands = 0 : i64, tpu.core_type = #tpu.core_type<tc>, window_params = [{transform_indices = @transform_0, window_bounds = array<i64: 16, 8>}, {transform_indices = @transform_1, window_bounds = array<i64: 8, 128>}, {transform_indices = @transform_2, window_bounds = array<i64: 16, 128>}]} {
    %c0 = arith.constant 0 : index
    %c0_0 = arith.constant 0 : index
    %0 = vector.load %arg3[%c0, %c0_0] : memref<16x8xf32, #tpu.memory_space<vmem>>, vector<16x8xf32>
    %c0_1 = arith.constant 0 : index
    %c0_2 = arith.constant 0 : index
    %1 = vector.load %arg4[%c0_1, %c0_2] : memref<8x128xf32, #tpu.memory_space<vmem>>, vector<8x128xf32>
    %cst = arith.constant dense<0.000000e+00> : vector<16x128xf32>
    %2 = tpu.matmul %0, %1, %cst {dimension_numbers = #tpu.dot_dimension_numbers<[1], [0], [0], [1], [0, 0, 1, 1], [], []>} : vector<16x8xf32>, vector<8x128xf32>, vector<16x128xf32> -> vector<16x128xf32>
    %c0_i32 = arith.constant 0 : i32
    %3 = arith.cmpi eq, %arg2, %c0_i32 : i32
    %4 = arith.extui %3 : i1 to i32
    %c0_i32_3 = arith.constant 0 : i32
    %5 = arith.cmpi ne, %4, %c0_i32_3 : i32
    scf.if %5 {
      %c0_6 = arith.constant 0 : index
      %c0_7 = arith.constant 0 : index
      %9 = vector.load %arg5[%c0_6, %c0_7] : memref<16x128xf32, #tpu.memory_space<vmem>>, vector<16x128xf32>
      tpu.vector_store %arg5[%c0_6, %c0_7], %2 {strides = array<i32>} : memref<16x128xf32, #tpu.memory_space<vmem>>, vector<16x128xf32>,
    } else {
    }
    %c0_i32_4 = arith.constant 0 : i32
    %6 = arith.cmpi sgt, %arg2, %c0_i32_4 : i32
    %7 = arith.extui %6 : i1 to i32
    %c0_i32_5 = arith.constant 0 : i32
    %8 = arith.cmpi ne, %7, %c0_i32_5 : i32
    scf.if %8 {
      %c0_6 = arith.constant 0 : index
      %c0_7 = arith.constant 0 : index
      %9 = vector.load %arg5[%c0_6, %c0_7] : memref<16x128xf32, #tpu.memory_space<vmem>>, vector<16x128xf32>
      %10 = arith.addf %9, %2 : vector<16x128xf32>
      %c0_8 = arith.constant 0 : index
      %c0_9 = arith.constant 0 : index
      %11 = vector.load %arg5[%c0_8, %c0_9] : memref<16x128xf32, #tpu.memory_space<vmem>>, vector<16x128xf32>
      tpu.vector_store %arg5[%c0_8, %c0_9], %10 {strides = array<i32>} : memref<16x128xf32, #tpu.memory_space<vmem>>, vector<16x128xf32>,
    } else {
    }
    return
  }
  func.func @transform_0(%arg0: i32, %arg1: i32, %arg2: i32) -> (i32, i32) {
    %c0_i32 = arith.constant 0 : i32
    return %arg0, %arg2 : i32, i32
  }
  func.func @transform_1(%arg0: i32, %arg1: i32, %arg2: i32) -> (i32, i32) {
    %c0_i32 = arith.constant 0 : i32
    return %arg2, %arg1 : i32, i32
  }
  func.func @transform_2(%arg0: i32, %arg1: i32, %arg2: i32) -> (i32, i32) {
    %c0_i32 = arith.constant 0 : i32
    return %arg0, %arg1 : i32, i32
  }
}

</mosaic_0001>

<bundles_post_ra>
// kernel: custom-call
= control target key start
LH: loop header
LB: loop body
LE: loop exit
PB: predicated region body
PF: predicated region fallthrough
CT: control target
= control target key end

     0   :  { %s92_s0 = inlined_call_operand.vmem [shape: f32[2,5,32], index: 0, kind: input, shape index: {}]   ;;  %s93_s1 = inlined_call_operand.vmem [shape: f32[2,5,32], index: 1, kind: input, shape index: {}]   ;;  %s94_s2 = inlined_call_operand.hbm [shape: c64[2,5,32], index: 2, kind: output, shape index: {}]  }
   0x1   :  { %s3_s11 = scalar_lea.hbm %s94_s2, 160 }
   0x2   :  { %4 = vsyncpa [#allocation0], 0  ;;  %s5_s14 = sshll.u32 %s92_s0, 4  ;;  %s6_s14 = int_to_ptr.vmem [resolvable:$true] %s5_s14 }
   0x3   :  { %s18_s15 = scalar_lea.vmem %s6_s14, 160  ;;  %p23_p1 = scmp.lt.s32.totalorder %s6_s14, %s6_s14 }
   0x4   :  { %p19_p0 = scmp.ne.s32.totalorder %s6_s14, %s18_s15  ;;  %p24_p2 = scmp.lt.s32.totalorder %s18_s15, %s18_s15 }
   0x6   :  { %p25_p3 = por %p24_p2, %p23_p1 }
   0x8   :  { %p26_p4 = pnand %p25_p3, %p19_p0 }
   0xa   :  { %29 = shalt.err (!%p26_p4)  }
   0xb   :  { %8 = dma.vmem_to_hbm [thread:$0]  %s6_s14, 160, %s94_s2, [#allocation0] }
   0xc   :  { %61 = dma.done.wait [#allocation0], 160  }
   0xd   :  { %62 = vsyncadd [#allocation0], 4294967136 }
   0xe   :  { %10 = vsyncpa [#allocation0], 1 }
   0xf   :  { %11 = vsyncpa [#allocation1], 0  ;;  %s12_s0 = sshll.u32 %s93_s1, 4  ;;  %s13_s0 = int_to_ptr.vmem [resolvable:$true] %s12_s0 }
  0x10   :  { %s38_s20 = scalar_lea.vmem %s13_s0, 160  ;;  %p43_p6 = scmp.lt.s32.totalorder %s13_s0, %s13_s0 }
  0x11   :  { %p39_p5 = scmp.ne.s32.totalorder %s13_s0, %s38_s20  ;;  %p44_p7 = scmp.lt.s32.totalorder %s38_s20, %s38_s20 }
  0x13   :  { %p45_p8 = por %p44_p7, %p43_p6 }
  0x15   :  { %p46_p9 = pnand %p45_p8, %p39_p5 }
  0x17   :  { %49 = shalt.err (!%p46_p9)  }
  0x18   :  { %15 = dma.vmem_to_hbm [thread:$0]  %s13_s0, 160, %s3_s11, [#allocation1] }
  0x19   :  { %63 = dma.done.wait [#allocation1], 160  }
  0x1a   :  { %64 = vsyncadd [#allocation1], 4294967136 }
  0x1b   :  { %17 = vsyncpa [#allocation1], 1 }

// kernel: rfft_module_forward.1
= control target key start
LH: loop header
LB: loop body
LE: loop exit
PB: predicated region body
PF: predicated region fallthrough
CT: control target
= control target key end

     0   :  { %vm14_vm0 = vcmask 64512   ;;  %s156_s1 = inlined_call_operand.vmem [shape: f32[8,128], index: 1, kind: input, shape index: {}]   ;;  %s157_s0 = inlined_call_operand.vmem [shape: f32[16,8], index: 0, kind: input, shape index: {}]   ;;  %s158_s2 = inlined_call_operand.vmem [shape: f32[16,128], index: 2, kind: output, shape index: {}]  }
   0x1   :  { %v13_v0 = vld [vmem:[%s156_s1] sm:$0xff]  ;;  %v12_v2 = vld [vmem:[%s157_s0 + $0x8] sm:$0xff] }
   0x2   :  { %v11_v1 = vld [vmem:[%s157_s0] sm:$0xff]  ;;  %121 = vmatprep.subr.mxu0 %v13_v0 }
   0x3   :  { %123 = vmatprep.mubr.msk.f32.mxu0 %vm14_vm0, %v11_v1  ;;  %122 = vmatpush3.msra.mxu0 %v13_v0 }
   0x4   :  { %124 = vmatmul.mubr.msk.f32.vlgmr.msra.gmra.mxu0 %vm14_vm0, %v12_v2 }
  0xc4   :  { %v125_v3 = vpop.f32.mrf.mxu0 }
  0xc5   :  { %101 = vst [vmem:[%s158_s2 + $0x8] sm:$0xff] %v125_v3 }
  0xc6   :  { %v87_v4 = vpop.f32.mrf.mxu0 }
  0xc7   :  { %100 = vst [vmem:[%s158_s2] sm:$0xff] %v87_v4 }

</bundles_post_ra>
